<compile_context>
chip_gen: v6e
topology: v6e:2x2x1
jax: 0.10.0
libtpu: 0.0.40
codegen_flags: <defaults>
</compile_context>

<pallas_src>
import numpy as np

import jax
import jax.numpy as jnp
from jax.experimental import pallas as pl
from jax.experimental.pallas import tpu as pltpu

_LANE = 128
_SUBLANE = 8


def _round_up(v, m):
    return ((v + m - 1) // m) * m


def _moving_avg_kernel(a_ref, x_ref, o_ref):
    """One lane tile: out = A @ x on the MXU.

    a_ref: (l_out_pad, L_pad) f32 averaging matrix (resident across steps).
    x_ref: (L_pad, TN) lane-dense input tile.
    o_ref: (l_out_pad, TN) lane-dense output tile.
    """
    x = x_ref[...]
    if x.dtype != jnp.float32:
        x = x.astype(jnp.float32)  # single hoisted cast
    o_ref[...] = jnp.dot(
        a_ref[...], x, preferred_element_type=jnp.float32
    ).astype(o_ref.dtype)


def _build_avg_matrix(L, L_pad, kernel_size, stride, pad, l_out, l_out_pad):
    # out[t] = (1/K) * sum_k x[clip(t*stride + k - pad, 0, L-1)]
    # (clip == replicate padding by (K-1)//2 on both sides, as in the module).
    # Extra padded rows/cols stay zero and are sliced off by the wrapper.
    pos = np.arange(l_out)[:, None] * stride + np.arange(kernel_size)[None, :] - pad
    pos = np.clip(pos, 0, L - 1)  # (l_out, K)
    a = np.zeros((l_out_pad, L_pad), np.float32)
    np.add.at(
        a,
        (np.repeat(np.arange(l_out), kernel_size), pos.ravel()),
        np.float32(1.0 / kernel_size),
    )
    return jnp.asarray(a)


def _pick_lane_tile(n_pad, L_pad, l_out_pad, itemsize, budget_bytes=2 << 20):
    """Largest lane tile whose double-buffered x+out footprint fits the budget,
    preferring >= 2 grid steps for pipelining / 2-TC balance."""
    candidates = [c for c in (1024, 512, 256, 128) if n_pad % c == 0]
    per_lane = 2 * (L_pad + l_out_pad) * itemsize  # x + out, double-buffered
    for tn in candidates:
        if per_lane * tn <= budget_bytes and n_pad // tn >= 2:
            return tn
    for tn in candidates:
        if per_lane * tn <= budget_bytes:
            return tn
    return 128  # n_pad is always a multiple of 128


def moving_avg(x, kernel_size, stride):
    """x: (B, L, C). Returns (B, l_out, C) moving average over time."""
    B, L, C = x.shape
    pad = (kernel_size - 1) // 2
    l_out = (L + 2 * pad - kernel_size) // stride + 1

    # Sublane-friendly padded time axes (zero rows/cols, removed afterwards).
    L_pad = _round_up(L, _SUBLANE)
    l_out_pad = _round_up(l_out, _SUBLANE)

    a = _build_avg_matrix(L, L_pad, kernel_size, stride, pad, l_out, l_out_pad)

    # Lane-dense repack: (B, L, C) -> (L, B*C), padded to lane/sublane multiples.
    n = B * C
    n_pad = _round_up(n, _LANE)
    xt = jnp.transpose(x, (1, 0, 2)).reshape(L, n)
    if (L_pad != L) or (n_pad != n):
        xt = jnp.pad(xt, ((0, L_pad - L), (0, n_pad - n)))

    itemsize = jnp.dtype(x.dtype).itemsize
    tn = _pick_lane_tile(n_pad, L_pad, l_out_pad, itemsize)
    grid = (n_pad // tn,)

    # 2x double-buffered x/out blocks + resident A block + slack.
    vmem_est = (
        2 * (L_pad * tn * itemsize + l_out_pad * tn * itemsize)
        + 2 * l_out_pad * L_pad * 4
        + (1 << 20)
    )
    vmem_limit = int(min(64 << 20, max(vmem_est, 4 << 20)))

    cost = pl.CostEstimate(
        flops=2 * l_out_pad * L_pad * n_pad,
        transcendentals=0,
        bytes_accessed=(L_pad * n_pad + l_out_pad * n_pad) * itemsize
        + l_out_pad * L_pad * 4,
    )

    out2d = pl.pallas_call(
        _moving_avg_kernel,
        out_shape=jax.ShapeDtypeStruct((l_out_pad, n_pad), x.dtype),
        grid_spec=pltpu.PrefetchScalarGridSpec(
            num_scalar_prefetch=0,
            grid=grid,
            in_specs=[
                pl.BlockSpec((l_out_pad, L_pad), lambda j: (0, 0)),  # A (resident)
                pl.BlockSpec((L_pad, tn), lambda j: (0, j)),         # x lane tile
            ],
            out_specs=pl.BlockSpec((l_out_pad, tn), lambda j: (0, j)),
        ),
        compiler_params=pltpu.CompilerParams(
            dimension_semantics=("parallel",),
            vmem_limit_bytes=vmem_limit,
        ),
        cost_estimate=cost,
    )(a, xt)

    out = out2d[:l_out, :n].reshape(l_out, B, C)
    return jnp.transpose(out, (1, 0, 2))


def _reference(x, kernel_size, stride):
    """Pure-JAX reference mirroring the PyTorch forward."""
    pad = (kernel_size - 1) // 2
    front = jnp.repeat(x[:, 0:1, :], pad, axis=1)
    end = jnp.repeat(x[:, -1:, :], pad, axis=1)
    xp = jnp.concatenate([front, x, end], axis=1)  # (B, L+2p, C)
    L_out = (xp.shape[1] - kernel_size) // stride + 1
    windows = jnp.stack(
        [xp[:, t * stride:t * stride + kernel_size, :] for t in range(L_out)],
        axis=1,
    )  # (B, L_out, K, C)
    return jnp.mean(windows, axis=2)


if __name__ == "__main__":
    key = jax.random.PRNGKey(0)

    configs = [
        # (B, L, C, kernel_size, stride)
        (2, 64, 24, 25, 1),   # module defaults: moving_avg=25, stride=1
        (2, 32, 8, 4, 2),     # even kernel, stride > 1
        (3, 36, 7, 25, 1),    # odd sizes: exercises sublane/lane padding paths
    ]
    for i, (B, L, C, K, S) in enumerate(configs):
        k = jax.random.fold_in(key, i)
        x = jax.random.normal(k, (B, L, C), dtype=jnp.float32)

        out = jax.block_until_ready(moving_avg(x, K, S))
        ref = _reference(x, K, S)

        assert out.shape == ref.shape, (out.shape, ref.shape)
        assert jnp.allclose(out, ref, atol=1e-5, rtol=1e-5), "mismatch vs reference"

    print("KERNEL_OK")
</pallas_src>

<mosaic_0001>
module attributes {stable_mosaic.version = 11 : i64} {
  func.func @_moving_avg_kernel(%arg0: i32, %arg1: memref<64x64xf32, #tpu.memory_space<vmem>>, %arg2: memref<64x128xf32, #tpu.memory_space<vmem>>, %arg3: memref<64x128xf32, #tpu.memory_space<vmem>>) attributes {dimension_semantics = [#tpu.dimension_semantics<parallel>], iteration_bounds = array<i64: 1>, scalar_prefetch = 0 : i64, scratch_operands = 0 : i64, tpu.core_type = #tpu.core_type<tc>, window_params = [{pipeline_mode = #tpu.pipeline_mode<synchronous>, transform_indices = @transform_0, window_bounds = array<i64: 64, 64>}, {transform_indices = @transform_1, window_bounds = array<i64: 64, 128>}, {transform_indices = @transform_2, window_bounds = array<i64: 64, 128>}]} {
    %c0 = arith.constant 0 : index
    %c0_0 = arith.constant 0 : index
    %0 = vector.load %arg2[%c0, %c0_0] : memref<64x128xf32, #tpu.memory_space<vmem>>, vector<64x128xf32>
    %c0_1 = arith.constant 0 : index
    %c0_2 = arith.constant 0 : index
    %1 = vector.load %arg1[%c0_1, %c0_2] : memref<64x64xf32, #tpu.memory_space<vmem>>, vector<64x64xf32>
    %cst = arith.constant dense<0.000000e+00> : vector<64x128xf32>
    %2 = tpu.matmul %1, %0, %cst {dimension_numbers = #tpu.dot_dimension_numbers<[1], [0], [0], [1], [0, 0, 1, 1], [], []>} : vector<64x64xf32>, vector<64x128xf32>, vector<64x128xf32> -> vector<64x128xf32>
    %c0_3 = arith.constant 0 : index
    %c0_4 = arith.constant 0 : index
    %3 = vector.load %arg3[%c0_3, %c0_4] : memref<64x128xf32, #tpu.memory_space<vmem>>, vector<64x128xf32>
    tpu.vector_store %arg3[%c0_3, %c0_4], %2 {strides = array<i32>} : memref<64x128xf32, #tpu.memory_space<vmem>>, vector<64x128xf32>,
    return
  }
  func.func @transform_0(%arg0: i32) -> (i32, i32) {
    %c0_i32 = arith.constant 0 : i32
    %c0_i32_0 = arith.constant 0 : i32
    %c0_i32_1 = arith.constant 0 : i32
    return %c0_i32, %c0_i32_0 : i32, i32
  }
  func.func @transform_1(%arg0: i32) -> (i32, i32) {
    %c0_i32 = arith.constant 0 : i32
    %c0_i32_0 = arith.constant 0 : i32
    return %c0_i32, %arg0 : i32, i32
  }
  func.func @transform_2(%arg0: i32) -> (i32, i32) {
    %c0_i32 = arith.constant 0 : i32
    %c0_i32_0 = arith.constant 0 : i32
    return %c0_i32, %arg0 : i32, i32
  }
}

</mosaic_0001>

<bundles_post_ra>
// kernel: tpu_custom_call.1
= control target key start
LH: loop header
LB: loop body
LE: loop exit
PB: predicated region body
PF: predicated region fallthrough
CT: control target
= control target key end

     0   :  { %7 = vsyncpa [#allocation3], 0  ;;  %s397_s0 = inlined_call_operand.hbm [shape: f32[64,64], index: 0, kind: input, shape index: {}]   ;;  %s398_s1 = inlined_call_operand.hbm [shape: f32[64,128], index: 1, kind: input, shape index: {}]   ;;  %s399_s2 = inlined_call_operand.hbm [shape: f32[64,128], index: 2, kind: output, shape index: {}]  }
   0x1   :  { %8 = vsyncpa [#allocation6], 0 }
   0x2   :  { %9 = vsyncpa [#allocation4], 0  ;;  %s351_s9 = smov [#allocation2]  }
   0x3   :  { %s15_s10 = sshll.u32 %s351_s9, 4  ;;  %s16_s10 = int_to_ptr.vmem [resolvable:$true] %s15_s10 }
   0x4   :  { %s293_s11 = scalar_lea.vmem %s16_s10, 1024  ;;  %p298_p1 = scmp.lt.s32.totalorder %s16_s10, %s16_s10 }
   0x5   :  { %p294_p0 = scmp.ne.s32.totalorder %s16_s10, %s293_s11  ;;  %p299_p2 = scmp.lt.s32.totalorder %s293_s11, %s293_s11 }
   0x7   :  { %p300_p3 = por %p299_p2, %p298_p1 }
   0x9   :  { %p301_p4 = pnand %p300_p3, %p294_p0 }
   0xb   :  { %304 = shalt.err (!%p301_p4)
}
   0xc   :  { %s352_s12 = smov 128   ;;  %s353_s13 = smov 8  }
   0xd   :  { %21 = dma.hbm_to_vmem [thread:$0]  %s397_s0, 1024, %s16_s10, [#allocation3], %s352_s12, %s352_s12, %s353_s13  }
   0xe   :  { %s354_s16 = smov [#allocation5]  }
   0xf   :  { %s27_s17 = sshll.u32 %s354_s16, 4  ;;  %s28_s17 = int_to_ptr.vmem [resolvable:$true] %s27_s17 }
  0x10   :  { %s313_s18 = scalar_lea.vmem %s28_s17, 1024  ;;  %p318_p6 = scmp.lt.s32.totalorder %s28_s17, %s28_s17 }
  0x11   :  { %p314_p5 = scmp.ne.s32.totalorder %s28_s17, %s313_s18  ;;  %p319_p7 = scmp.lt.s32.totalorder %s313_s18, %s313_s18 }
  0x13   :  { %p320_p8 = por %p319_p7, %p318_p6 }
  0x15   :  { %p321_p9 = pnand %p320_p8, %p314_p5 }
  0x17   :  { %324 = shalt.err (!%p321_p9)
}
  0x18   :  { %33 = dma.hbm_to_vmem [thread:$0]  %s398_s1, 1024, %s28_s17, [#allocation6], %s352_s12, %s352_s12, %s353_s13  }
  0x19   :  { %345 = dma.done.wait [#allocation3], 1024  }
  0x1a   :  { %346 = vsyncadd [#allocation3], 4294966272 }
  0x1b   :  { %347 = dma.done.wait [#allocation6], 1024  }
  0x1c   :  { %348 = vsyncadd [#allocation6], 4294966272  ;;  %v47_v0 = vld [vmem:[#allocation5 + $0x38] sm:$0xff]  ;;  %v46_v1 = vld [vmem:[#allocation5 + $0x30] sm:$0xff]  ;;  %vm56_vm0 = vcmask 523264   ;;  %s355_s0 = smov [#allocation7]  }
  0x1d   :  { %236 = vmatprep.subr.mxu0 %v47_v0  ;;  %264 = vmatprep.subr.mxu1 %v47_v0  ;;  %v45_v2 = vld [vmem:[#allocation5 + $0x28] sm:$0xff]  ;;  %v44_v3 = vld [vmem:[#allocation5 + $0x20] sm:$0xff]  ;;  %v43_v4 = vld [vmem:[#allocation5 + $0x18] sm:$0xff]  ;;  %s199_s1 = sshll.u32 %s355_s0, 4  ;;  %s200_s1 = int_to_ptr.vmem [resolvable:$true] %s199_s1 }
  0x1e   :  { %237 = vmatpush3.msra.mxu0 %v47_v0  ;;  %272 = vmatpush3.msra.mxu1 %v47_v0  ;;  %v42_v5 = vld [vmem:[#allocation5 + $0x10] sm:$0xff]  ;;  %v41_v6 = vld [vmem:[#allocation5 + $0x8] sm:$0xff]  ;;  %v40_v7 = vld [vmem:[#allocation5] sm:$0xff]  ;;  %s325_s21 = scalar_lea.vmem %s200_s1, 1024  ;;  %p330_p11 = scmp.lt.s32.totalorder %s200_s1, %s200_s1 }
  0x1f   :  { %238 = vmatprep.subr.mxu0 %v46_v1  ;;  %265 = vmatprep.subr.mxu1 %v46_v1  ;;  %v48_v8 = vld [vmem:[#allocation2] sm:$0xff]  ;;  %v49_v10 = vld [vmem:[#allocation2 + $0x8] sm:$0xff]  ;;  %v50_v12 = vld [vmem:[#allocation2 + $0x10] sm:$0xff]  ;;  %p326_p10 = scmp.ne.s32.totalorder %s200_s1, %s325_s21  ;;  %p331_p12 = scmp.lt.s32.totalorder %s325_s21, %s325_s21 }
  0x20   :  { %239 = vmatpush3.msra.mxu0 %v46_v1  ;;  %273 = vmatpush3.msra.mxu1 %v46_v1  ;;  %v52_v9 = vld [vmem:[#allocation2 + $0x20] sm:$0xff]  ;;  %v53_v11 = vld [vmem:[#allocation2 + $0x28] sm:$0xff]  ;;  %v54_v13 = vld [vmem:[#allocation2 + $0x30] sm:$0xff] }
  0x21   :  { %240 = vmatprep.subr.mxu0 %v45_v2  ;;  %266 = vmatprep.subr.mxu1 %v45_v2  ;;  %v51_v14 = vld [vmem:[#allocation2 + $0x18] sm:$0xff]  ;;  %p332_p13 = por %p331_p12, %p330_p11 }
  0x22   :  { %241 = vmatpush3.msra.mxu0 %v45_v2  ;;  %274 = vmatpush3.msra.mxu1 %v45_v2  ;;  %v55_v15 = vld [vmem:[#allocation2 + $0x38] sm:$0xff] }
  0x23   :  { %242 = vmatprep.subr.mxu0 %v44_v3  ;;  %267 = vmatprep.subr.mxu1 %v44_v3  ;;  %p333_p0 = pnand %p332_p13, %p326_p10 }
  0x24   :  { %243 = vmatpush3.msra.mxu0 %v44_v3  ;;  %275 = vmatpush3.msra.mxu1 %v44_v3 }
  0x25   :  { %244 = vmatprep.subr.mxu0 %v43_v4  ;;  %268 = vmatprep.subr.mxu1 %v43_v4 }
  0x26   :  { %245 = vmatpush3.msra.mxu0 %v43_v4  ;;  %276 = vmatpush3.msra.mxu1 %v43_v4 }
  0x27   :  { %246 = vmatprep.subr.mxu0 %v42_v5  ;;  %269 = vmatprep.subr.mxu1 %v42_v5 }
  0x28   :  { %247 = vmatpush3.msra.mxu0 %v42_v5  ;;  %277 = vmatpush3.msra.mxu1 %v42_v5 }
  0x29   :  { %248 = vmatprep.subr.mxu0 %v41_v6  ;;  %270 = vmatprep.subr.mxu1 %v41_v6 }
  0x2a   :  { %249 = vmatpush3.msra.mxu0 %v41_v6  ;;  %278 = vmatpush3.msra.mxu1 %v41_v6 }
  0x2b   :  { %250 = vmatprep.subr.mxu0 %v40_v7  ;;  %271 = vmatprep.subr.mxu1 %v40_v7 }
  0x2c   :  { %251 = vmatpush3.msra.mxu0 %v40_v7  ;;  %279 = vmatpush3.msra.mxu1 %v40_v7 }
  0x2d   :  { %252 = vmatprep.mubr.msk.f32.mxu0 %vm56_vm0, %v48_v8  ;;  %258 = vmatprep.mubr.msk.f32.mxu1 %vm56_vm0, %v52_v9 }
  0x2e   :  { %253 = vmatmul.mubr.msk.f32.vlgmr.msra.gmra.mxu0 %vm56_vm0, %v49_v10  ;;  %259 = vmatmul.mubr.msk.f32.vlgmr.msra.gmra.mxu1 %vm56_vm0, %v53_v11 }
  0x2f   :  { %255 = vmatprep.mubr.msk.f32.mxu0 %vm56_vm0, %v50_v12  ;;  %261 = vmatprep.mubr.msk.f32.mxu1 %vm56_vm0, %v54_v13 }
  0x32   :  { %256 = vmatmul.mubr.msk.f32.gmra.mxu0 %vm56_vm0, %v51_v14  ;;  %262 = vmatmul.mubr.msk.f32.gmra.mxu1 %vm56_vm0, %v55_v15 }
  0xee   :  { %v254_v16 = vpop.f32.mrf.mxu0  ;;  %v260_v17 = vpop.f32.mrf.mxu1 }
  0xef   :  { %187 = vst [vmem:[#allocation7 + $0x8] sm:$0xff] %v254_v16  ;;  %191 = vst [vmem:[#allocation7 + $0x28] sm:$0xff] %v260_v17 }
  0xf0   :  { %v147_v18 = vpop.f32.mrf.mxu0  ;;  %v167_v19 = vpop.f32.mrf.mxu1 }
  0xf1   :  { %186 = vst [vmem:[#allocation7] sm:$0xff] %v147_v18  ;;  %190 = vst [vmem:[#allocation7 + $0x20] sm:$0xff] %v167_v19 }
  0xf2   :  { %v257_v20 = vpop.f32.mrf.mxu0  ;;  %v263_v21 = vpop.f32.mrf.mxu1 }
  0xf3   :  { %189 = vst [vmem:[#allocation7 + $0x18] sm:$0xff] %v257_v20  ;;  %193 = vst [vmem:[#allocation7 + $0x38] sm:$0xff] %v263_v21 }
  0xf4   :  { %v157_v22 = vpop.f32.mrf.mxu0  ;;  %v177_v23 = vpop.f32.mrf.mxu1 }
  0xf5   :  { %188 = vst [vmem:[#allocation7 + $0x10] sm:$0xff] %v157_v22  ;;  %192 = vst [vmem:[#allocation7 + $0x30] sm:$0xff] %v177_v23 }
  0xf6   :  { %336 = shalt.err (!%p333_p0)
}
  0xf7   :  { %205 = dma.vmem_to_hbm [thread:$0]  %s200_s1, 1024, %s399_s2, [#allocation4], %s352_s12, %s352_s12, %s353_s13  }
  0xf8   :  { %349 = dma.done.wait [#allocation4], 1024  }
  0xf9   :  { %350 = vsyncadd [#allocation4], 4294966272 }
  0xfa   :  { %209 = vsyncpa [#allocation3], 1 }
  0xfb   :  { %210 = vsyncpa [#allocation6], 1 }
  0xfc   :  { %211 = vsyncpa [#allocation4], 1 }

</bundles_post_ra>
